<compile_context>
chip_gen: v7x
topology: tpu7x:2x2x1
jax: 0.10.0
libtpu: 0.0.40
codegen_flags: <defaults>
</compile_context>

<pallas_src>
import functools

import jax
import jax.numpy as jnp
from jax.experimental import pallas as pl
from jax.experimental.pallas import tpu as pltpu


# --------------------------------------------------------------------------
# hardware / tiling helpers
# --------------------------------------------------------------------------
def _round_up(x, m):
    return (x + m - 1) // m * m


def _vmem_capacity_bytes():
    try:
        return int(pltpu.get_tpu_info().vmem_capacity_bytes)
    except Exception:
        return 64 << 20  # conservative default (v7x has the smallest VMEM)


def _budgets():
    cap = _vmem_capacity_bytes()
    usable = int(cap * 0.85)            # headroom for compiler temporaries
    if cap >= (100 << 20):              # v5e / v6e: 128 MiB physical VMEM
        block_budget = 12 << 20
    else:                               # v7x: 64 MiB physical VMEM
        block_budget = 6 << 20
    return usable, block_budget


def _sublane_fold(C, HW, itemsize):
    """Fold factor f: view (C, HW) as (C*f, HW//f) (pure reshape, same memory
    order) so the sublane axis approaches a full pack while the lane axis
    stays a multiple of 128.  gamma/beta are repeated f times so folded row r
    still maps to original channel r // f; per-sample stats are unchanged."""
    pack = {4: 8, 2: 16, 1: 32}.get(itemsize, 8)
    if C % pack == 0:
        return 1
    best = 1
    for f in range(2, pack + 1):
        if HW % f or (HW // f) % 128:
            continue                     # never sacrifice lane density
        if (C * f) % pack == 0:
            return f                     # fully packed sublanes + dense lanes
        if C * f <= pack and f > best:
            best = f                     # partially filled, still an improvement
    return best


def _choose_hw_tile(Cf, HWf, itemsize, block_budget):
    """Lane tile T (multiple of 128) for the two-pass fallback.  Ragged tails
    are handled with pl.cdiv + masking, so T need not divide HWf."""
    max_t = max(128, (block_budget // max(1, Cf * itemsize)) // 128 * 128)
    return int(min(_round_up(HWf, 128), max_t))


def _vmem_limit(need_bytes, usable):
    return int(min(max(need_bytes, 16 << 20), usable))


# --------------------------------------------------------------------------
# fused path: one HBM read of x per sample (stats + normalize + affine)
# --------------------------------------------------------------------------
def _fused_kernel(g_ref, b_ref, x_ref, o_ref, *, n_elems, eps):
    x = x_ref[...].astype(jnp.float32)                        # (Cf, HWf)
    s = jnp.sum(jnp.sum(x, axis=1, keepdims=True), axis=0, keepdims=True)
    mean = s * (1.0 / n_elems)                                # (1, 1)
    xc = x - mean                                             # centered -> robust
    ss = jnp.sum(jnp.sum(xc * xc, axis=1, keepdims=True), axis=0, keepdims=True)
    # NOTE: torch returns NaN for a 1-element sample; we guard instead.
    var = ss * (1.0 / max(n_elems - 1, 1))                    # unbiased (n-1)
    inv = 1.0 / (jnp.sqrt(var) + eps)                         # 1 / (std + eps)
    scale = g_ref[...] * inv                                  # (Cf, 1)
    o_ref[...] = (xc * scale + b_ref[...]).astype(o_ref.dtype)


# --------------------------------------------------------------------------
# fallback pass 1: streaming (pivot-shifted) sums -> mean, 1/(std + eps)
# --------------------------------------------------------------------------
def _stats_kernel(x_ref, mean_ref, inv_ref, piv_ref, s1_ref, s2_ref,
                  *, n_elems, hwf, tile, eps):
    j = pl.program_id(1)
    x = x_ref[...].astype(jnp.float32)                        # (Cf, T)
    col = j * tile + jax.lax.broadcasted_iota(jnp.int32, x.shape, 1)
    valid = col < hwf                                         # ragged-tail mask
    x = jnp.where(valid, x, 0.0)

    @pl.when(j == 0)
    def _init():
        # Any constant works as the pivot; the first tile's mean keeps the
        # single-pass sums well conditioned for large-mean inputs.
        piv_ref[...] = jnp.sum(
            jnp.sum(x, axis=1, keepdims=True), axis=0, keepdims=True
        ) * (1.0 / (x.shape[0] * x.shape[1]))
        s1_ref[...] = jnp.zeros_like(s1_ref)
        s2_ref[...] = jnp.zeros_like(s2_ref)

    xc = jnp.where(valid, x - piv_ref[...], 0.0)
    # per-sublane partials; cross-sublane XLU reduce deferred to finalize
    s1_ref[...] += jnp.sum(xc, axis=1, keepdims=True)
    s2_ref[...] += jnp.sum(xc * xc, axis=1, keepdims=True)

    @pl.when(j == pl.num_programs(1) - 1)
    def _finalize():
        s1 = jnp.sum(s1_ref[...], axis=0, keepdims=True)
        s2 = jnp.sum(s2_ref[...], axis=0, keepdims=True)
        mean_ref[...] = piv_ref[...] + s1 * (1.0 / n_elems)
        # NOTE: torch returns NaN for a 1-element sample; we guard instead.
        var = jnp.maximum(
            (s2 - s1 * s1 * (1.0 / n_elems)) * (1.0 / max(n_elems - 1, 1)), 0.0)
        inv_ref[...] = 1.0 / (jnp.sqrt(var) + eps)


# --------------------------------------------------------------------------
# fallback pass 2: y = x * scale + shift   (scale/shift precomputed per sample)
# --------------------------------------------------------------------------
def _normalize_kernel(scale_ref, shift_ref, x_ref, o_ref):
    x = x_ref[...].astype(jnp.float32)
    o_ref[...] = (x * scale_ref[...] + shift_ref[...]).astype(o_ref.dtype)


# --------------------------------------------------------------------------
# wrapper
# --------------------------------------------------------------------------
def layer_norm(x, gamma, beta, eps=1e-5, *, block_bytes=None, force_two_pass=False):
    """x: (N, C, H, W). gamma, beta: (C,). Matches the PyTorch module forward."""
    N, C, H, W = x.shape
    HW = H * W
    n_elems = C * HW
    itemsize = jnp.dtype(x.dtype).itemsize
    usable_vmem, default_block = _budgets()
    block_budget = default_block if block_bytes is None else int(block_bytes)

    f = _sublane_fold(C, HW, itemsize)
    Cf, HWf = C * f, HW // f
    x3 = x.reshape(N, Cf, HWf)                       # pure view, same order
    g2 = jnp.repeat(gamma.astype(jnp.float32), f).reshape(Cf, 1)
    b2 = jnp.repeat(beta.astype(jnp.float32), f).reshape(Cf, 1)

    slab = Cf * HWf * itemsize
    slab_f32 = Cf * HWf * 4
    # fused footprint: double-buffered in + out blocks + ~3 f32 temporaries
    fused_need = 4 * slab + 3 * slab_f32 + (2 << 20)

    if not force_two_pass and fused_need <= usable_vmem:
        out = pl.pallas_call(
            functools.partial(_fused_kernel, n_elems=n_elems, eps=float(eps)),
            out_shape=jax.ShapeDtypeStruct((N, Cf, HWf), x.dtype),
            grid_spec=pltpu.PrefetchScalarGridSpec(
                num_scalar_prefetch=0,
                grid=(N,),
                in_specs=[
                    pl.BlockSpec((Cf, 1), lambda i: (0, 0)),            # gamma (f32)
                    pl.BlockSpec((Cf, 1), lambda i: (0, 0)),            # beta  (f32)
                    pl.BlockSpec((None, Cf, HWf), lambda i: (i, 0, 0)), # sample slab
                ],
                out_specs=pl.BlockSpec((None, Cf, HWf), lambda i: (i, 0, 0)),
            ),
            compiler_params=pltpu.CompilerParams(
                dimension_semantics=("parallel",),
                vmem_limit_bytes=_vmem_limit(fused_need, usable_vmem),
            ),
        )(g2, b2, x3)
        return out.reshape(N, C, H, W)

    # ---- fallback: two-pass streaming path (per-sample slab too big) ----
    # TODO(synk): for N==1 on v7x, split the stats reduction across both
    # TensorCores (partial sums output (N,2,1,1) + trivial XLA combine).
    T = _choose_hw_tile(Cf, HWf, itemsize, block_budget)
    n_t = pl.cdiv(HWf, T)
    x_block = Cf * T * itemsize

    mean, inv = pl.pallas_call(
        functools.partial(_stats_kernel, n_elems=n_elems, hwf=HWf, tile=T,
                          eps=float(eps)),
        out_shape=(
            jax.ShapeDtypeStruct((N, 1, 1), jnp.float32),
            jax.ShapeDtypeStruct((N, 1, 1), jnp.float32),
        ),
        grid_spec=pltpu.PrefetchScalarGridSpec(
            num_scalar_prefetch=0,
            grid=(N, n_t),
            in_specs=[pl.BlockSpec((None, Cf, T), lambda i, j: (i, 0, j))],
            out_specs=(
                pl.BlockSpec((None, 1, 1), lambda i, j: (i, 0, 0)),
                pl.BlockSpec((None, 1, 1), lambda i, j: (i, 0, 0)),
            ),
            scratch_shapes=[
                pltpu.VMEM((1, 1), jnp.float32),    # pivot
                pltpu.VMEM((Cf, 1), jnp.float32),   # per-sublane running sum
                pltpu.VMEM((Cf, 1), jnp.float32),   # per-sublane running sum-sq
            ],
        ),
        compiler_params=pltpu.CompilerParams(
            dimension_semantics=("parallel", "arbitrary"),
            vmem_limit_bytes=_vmem_limit(2 * x_block + (4 << 20), usable_vmem),
        ),
    )(x3)

    # hoisted per-sample scale/shift (tiny XLA op between the passes)
    mean2 = mean.reshape(N, 1)
    inv2 = inv.reshape(N, 1)
    scale = g2.reshape(1, Cf) * inv2                  # (N, Cf)
    shift = b2.reshape(1, Cf) - mean2 * scale         # (N, Cf)
    scale3 = scale.reshape(N, Cf, 1)
    shift3 = shift.reshape(N, Cf, 1)

    out = pl.pallas_call(
        _normalize_kernel,
        out_shape=jax.ShapeDtypeStruct((N, Cf, HWf), x.dtype),
        grid_spec=pltpu.PrefetchScalarGridSpec(
            num_scalar_prefetch=0,
            grid=(N, n_t),
            in_specs=[
                pl.BlockSpec((None, Cf, 1), lambda i, j: (i, 0, 0)),   # scale
                pl.BlockSpec((None, Cf, 1), lambda i, j: (i, 0, 0)),   # shift
                pl.BlockSpec((None, Cf, T), lambda i, j: (i, 0, j)),   # x tile
            ],
            out_specs=pl.BlockSpec((None, Cf, T), lambda i, j: (i, 0, j)),
        ),
        compiler_params=pltpu.CompilerParams(
            dimension_semantics=("parallel", "parallel"),
            vmem_limit_bytes=_vmem_limit(4 * x_block + (4 << 20), usable_vmem),
        ),
    )(scale3, shift3, x3)

    return out.reshape(N, C, H, W)


# --------------------------------------------------------------------------
# pure-JAX reference mirroring the PyTorch forward
# --------------------------------------------------------------------------
def _reference(x, gamma, beta, eps=1e-5):
    N = x.shape[0]
    flat = x.reshape(N, -1).astype(jnp.float32)
    mean = flat.mean(axis=1)
    var = jnp.sum((flat - mean[:, None]) ** 2, axis=1) / (flat.shape[1] - 1)
    std = jnp.sqrt(var)
    y = (x.astype(jnp.float32) - mean.reshape(N, 1, 1, 1)) / (
        std.reshape(N, 1, 1, 1) + eps
    )
    y = y * gamma.reshape(1, -1, 1, 1) + beta.reshape(1, -1, 1, 1)
    return y.astype(x.dtype)


if __name__ == "__main__":
    key = jax.random.PRNGKey(0)
    k1, k2, k3, k4, k5, k6 = jax.random.split(key, 6)

    # 1) primary shape (matches the module's intended NCHW usage) -> fused path
    N, C, H, W = 2, 4, 16, 16
    x = jax.random.normal(k1, (N, C, H, W), dtype=jnp.float32)
    gamma = jax.random.uniform(k2, (C,), dtype=jnp.float32)   # gamma ~ U[0,1)
    beta = jnp.zeros((C,), dtype=jnp.float32)                 # beta = 0
    out = jax.block_until_ready(layer_norm(x, gamma, beta, eps=1e-5))
    ref = _reference(x, gamma, beta, eps=1e-5)
    assert out.shape == (N, C, H, W)
    assert jnp.allclose(out, ref, atol=1e-4, rtol=1e-4), float(
        jnp.max(jnp.abs(out - ref)))

    # 2) two-pass fallback with a ragged lane tail: HWf=640, T=256, n_t=3,
    #    large-mean input exercises the pivot-shifted accumulation.
    N2, C2, H2, W2 = 2, 8, 16, 40
    x2 = jax.random.normal(k3, (N2, C2, H2, W2), dtype=jnp.float32) * 3.0 + 7.0
    gamma2 = jax.random.uniform(k4, (C2,), dtype=jnp.float32)
    beta2 = jax.random.normal(k5, (C2,), dtype=jnp.float32) * 0.1
    out2 = jax.block_until_ready(
        layer_norm(x2, gamma2, beta2, eps=1e-5,
                   block_bytes=C2 * 256 * 4, force_two_pass=True))
    ref2 = _reference(x2, gamma2, beta2, eps=1e-5)
    assert jnp.allclose(out2, ref2, atol=1e-4, rtol=1e-4), float(
        jnp.max(jnp.abs(out2 - ref2)))

    # 3) bf16 input exercises the dtype-aware sublane fold (pack=16 -> f=2)
    N3, C3, H3, W3 = 2, 8, 16, 32
    x3 = jax.random.normal(k6, (N3, C3, H3, W3), dtype=jnp.float32).astype(
        jnp.bfloat16)
    gamma3 = jnp.ones((C3,), dtype=jnp.float32)
    beta3 = jnp.zeros((C3,), dtype=jnp.float32)
    out3 = jax.block_until_ready(layer_norm(x3, gamma3, beta3, eps=1e-5))
    ref3 = _reference(x3, gamma3, beta3, eps=1e-5)
    assert jnp.allclose(out3.astype(jnp.float32), ref3.astype(jnp.float32),
                        atol=5e-2, rtol=5e-2)

    print("KERNEL_OK")
</pallas_src>

<mosaic_0001>
module attributes {stable_mosaic.version = 11 : i64} {
  func.func @_fused_kernel(%arg0: i32, %arg1: memref<8x1xf32, #tpu.memory_space<vmem>>, %arg2: memref<8x1xf32, #tpu.memory_space<vmem>>, %arg3: memref<1x8x128xf32, #tpu.memory_space<vmem>>, %arg4: memref<1x8x128xf32, #tpu.memory_space<vmem>>) attributes {dimension_semantics = [#tpu.dimension_semantics<parallel>], iteration_bounds = array<i64: 2>, scalar_prefetch = 0 : i64, scratch_operands = 0 : i64, tpu.core_type = #tpu.core_type<tc>, window_params = [{pipeline_mode = #tpu.pipeline_mode<synchronous>, transform_indices = @transform_0, window_bounds = array<i64: 8, 1>}, {pipeline_mode = #tpu.pipeline_mode<synchronous>, transform_indices = @transform_1, window_bounds = array<i64: 8, 1>}, {transform_indices = @transform_2, window_bounds = array<i64: 1, 8, 128>}, {transform_indices = @transform_3, window_bounds = array<i64: 1, 8, 128>}]} {
    %c0 = arith.constant 0 : index
    %c0_0 = arith.constant 0 : index
    %c0_1 = arith.constant 0 : index
    %0 = vector.load %arg3[%c0, %c0_0, %c0_1] : memref<1x8x128xf32, #tpu.memory_space<vmem>>, vector<1x8x128xf32>
    %1 = vector.shape_cast %0 : vector<1x8x128xf32> to vector<8x128xf32>
    %cst = arith.constant dense<0.000000e+00> : vector<8xf32>
    %2 = vector.multi_reduction <add>, %1, %cst [1] : vector<8x128xf32> to vector<8xf32>
    %3 = vector.shape_cast %2 : vector<8xf32> to vector<8x1xf32>
    %cst_2 = arith.constant dense<0.000000e+00> : vector<1xf32>
    %4 = vector.multi_reduction <add>, %3, %cst_2 [0] : vector<8x1xf32> to vector<1xf32>
    %5 = vector.shape_cast %4 : vector<1xf32> to vector<1x1xf32>
    %cst_3 = arith.constant 9.765625E-4 : f32
    %6 = vector.broadcast %cst_3 : f32 to vector<1x1xf32>
    %7 = arith.mulf %5, %6 : vector<1x1xf32>
    %8 = vector.broadcast %7 : vector<1x1xf32> to vector<8x128xf32>
    %9 = arith.subf %1, %8 : vector<8x128xf32>
    %10 = arith.mulf %9, %9 : vector<8x128xf32>
    %cst_4 = arith.constant dense<0.000000e+00> : vector<8xf32>
    %11 = vector.multi_reduction <add>, %10, %cst_4 [1] : vector<8x128xf32> to vector<8xf32>
    %12 = vector.shape_cast %11 : vector<8xf32> to vector<8x1xf32>
    %cst_5 = arith.constant dense<0.000000e+00> : vector<1xf32>
    %13 = vector.multi_reduction <add>, %12, %cst_5 [0] : vector<8x1xf32> to vector<1xf32>
    %14 = vector.shape_cast %13 : vector<1xf32> to vector<1x1xf32>
    %cst_6 = arith.constant 9.77517105E-4 : f32
    %15 = vector.broadcast %cst_6 : f32 to vector<1x1xf32>
    %16 = arith.mulf %14, %15 : vector<1x1xf32>
    %17 = math.sqrt %16 : vector<1x1xf32>
    %cst_7 = arith.constant 9.99999974E-6 : f32
    %18 = vector.broadcast %cst_7 : f32 to vector<1x1xf32>
    %19 = arith.addf %17, %18 : vector<1x1xf32>
    %cst_8 = arith.constant 1.000000e+00 : f32
    %20 = vector.broadcast %cst_8 : f32 to vector<1x1xf32>
    %21 = arith.divf %20, %19 : vector<1x1xf32>
    %c0_9 = arith.constant 0 : index
    %c0_10 = arith.constant 0 : index
    %22 = vector.load %arg1[%c0_9, %c0_10] : memref<8x1xf32, #tpu.memory_space<vmem>>, vector<8x1xf32>
    %23 = vector.broadcast %21 : vector<1x1xf32> to vector<8x1xf32>
    %24 = arith.mulf %22, %23 : vector<8x1xf32>
    %25 = vector.broadcast %24 : vector<8x1xf32> to vector<8x128xf32>
    %26 = arith.mulf %9, %25 : vector<8x128xf32>
    %c0_11 = arith.constant 0 : index
    %c0_12 = arith.constant 0 : index
    %27 = vector.load %arg2[%c0_11, %c0_12] : memref<8x1xf32, #tpu.memory_space<vmem>>, vector<8x1xf32>
    %28 = vector.broadcast %27 : vector<8x1xf32> to vector<8x128xf32>
    %29 = arith.addf %26, %28 : vector<8x128xf32>
    %c0_13 = arith.constant 0 : index
    %c0_14 = arith.constant 0 : index
    %c0_15 = arith.constant 0 : index
    %30 = vector.load %arg4[%c0_13, %c0_14, %c0_15] : memref<1x8x128xf32, #tpu.memory_space<vmem>>, vector<1x8x128xf32>
    %31 = vector.shape_cast %30 : vector<1x8x128xf32> to vector<8x128xf32>
    %32 = vector.shape_cast %29 : vector<8x128xf32> to vector<1x8x128xf32>
    tpu.vector_store %arg4[%c0_13, %c0_14, %c0_15], %32 {strides = array<i32>} : memref<1x8x128xf32, #tpu.memory_space<vmem>>, vector<1x8x128xf32>,
    return
  }
  func.func @transform_0(%arg0: i32) -> (i32, i32) {
    %c0_i32 = arith.constant 0 : i32
    %c0_i32_0 = arith.constant 0 : i32
    %c0_i32_1 = arith.constant 0 : i32
    return %c0_i32, %c0_i32_0 : i32, i32
  }
  func.func @transform_1(%arg0: i32) -> (i32, i32) {
    %c0_i32 = arith.constant 0 : i32
    %c0_i32_0 = arith.constant 0 : i32
    %c0_i32_1 = arith.constant 0 : i32
    return %c0_i32, %c0_i32_0 : i32, i32
  }
  func.func @transform_2(%arg0: i32) -> (i32, i32, i32) {
    %c0_i32 = arith.constant 0 : i32
    %c0_i32_0 = arith.constant 0 : i32
    %c0_i32_1 = arith.constant 0 : i32
    return %arg0, %c0_i32, %c0_i32_0 : i32, i32, i32
  }
  func.func @transform_3(%arg0: i32) -> (i32, i32, i32) {
    %c0_i32 = arith.constant 0 : i32
    %c0_i32_0 = arith.constant 0 : i32
    %c0_i32_1 = arith.constant 0 : i32
    return %arg0, %c0_i32, %c0_i32_0 : i32, i32, i32
  }
}

</mosaic_0001>

<bundles_post_ra>
// kernel: tpu_custom_call.1
= control target key start
LH: loop header
LB: loop body
LE: loop exit
PB: predicated region body
PF: predicated region fallthrough
CT: control target
= control target key end

     0   :  { %8 = vsyncpa [#allocation3], 0  ;;  %s534_s0 = inlined_call_operand.vmem [shape: f32[8,1], index: 0, kind: input, shape index: {}]   ;;  %s535_s1 = inlined_call_operand.vmem [shape: f32[8,1], index: 1, kind: input, shape index: {}]   ;;  %s536_s2 = inlined_call_operand.vmem [shape: f32[2,8,128], index: 2, kind: input, shape index: {}]   ;;  %s537_s3 = inlined_call_operand.hbm [shape: f32[2,8,128], index: 3, kind: output, shape index: {}]  }
   0x1   :  { %10 = vsyncpa [#allocation3 + $0x1], 0  ;;  %s428_s12 = smov 0   ;;  %s430_s13 = smov 0  }
   0x2   :  { %s432_s14 = smov 0   ;;  %s434_s15 = smov 0  }
   0x3 LB: > { %s449_s16 = sadd.s32 4294967295, %s404_s15   ;;  %s286_s17 = sadd.s32 4294967294, %s404_s15   ;;  %s404_s15 = sphi %s434_s15, %s543_s15   ;;  %s400_s14 = sphi %s432_s14, %s542_s14   ;;  %s396_s13 = sphi %s430_s13, %s541_s13   ;;  %s392_s12 = sphi %s428_s12, %s540_s12  }
   0x4   : > { %s453_s18 = sadd.s32 1, %s404_s15   ;;  %s91_s19 = sadd.s32 1, %s400_s14 }
   0x5   : > { %s88_s20 = ssub.s32 %s404_s15, %s453_s18  ;;  %p101_p0 = scmp.ne.s32.totalorder %s400_s14, %s396_s13 }
   0x6   : > { %p89_p1 = scmp.eq.s32.totalorder %s88_s20, 0  ;;  %p102_p2 = scmp.eq.s32.totalorder %s449_s16, 1 }
   0x7   : > { %p107_p3 = scmp.ne.s32.totalorder %s396_s13, %s392_s12  ;;  %p108_p4 = scmp.eq.s32.totalorder %s286_s17, 1 }
   0x8   : > { %s464_s21 = scalar_select %p89_p1, %s400_s14, %s91_s19  }
   0x9   : > { %p466_p5 = por %p102_p2, %p101_p0  ;;  %p470_p6 = por %p108_p4, %p107_p3 }
   0xa   : > { %p289_p7 = scmp.ge.s32.totalorder %s404_s15, 1  ;;  %p139_p8 = scmp.lt.s32.totalorder %s404_s15, 3 }
   0xc   : > { %p140_p9 = pnand %p289_p7, %p139_p8 }
   0xd   : > { %p162_p10 = scmp.lt.s32.totalorder (!%p140_p9), %s449_s16, 1  ;;  %v406_v11 = vmov (!%p140_p9), 0   ;;  %v197_v26 = vld [vmem:[%s534_s0] sm:$0xff] (!%p140_p9)  ;;  %s159_s6 = sand.u32 (!%p140_p9), 1, %s396_s13  }
   0xe   : > { %143 = sbr.rel (%p140_p9) target bundleno = 520 (0x208), region = 32  ;;  %336 = vset.pattern.permute.xlu1 (!%p140_p9), %v406_v11  ;;  %337 = vset.pattern.permute.xlu0 (!%p140_p9), %v406_v11  ;;  %v205_v29 = vld [vmem:[%s535_s1] sm:$0xff] (!%p140_p9)  ;;  %s290_s7 = sshll.u32 (!%p140_p9), %s159_s6, 3 }
   0xf   : > { %s293_s8 = sshll.u32 (!%p140_p9), %s449_s16, 7  ;;  %s161_s9 = scalar_lea.vmem (!%p140_p9), [#allocation2], %s290_s7 }
  0x10   : > { %s227_s10 = sshll.u32 (!%p140_p9), %s161_s9, 4  ;;  %s492_s19 = scalar_lea.hbm (!%p140_p9), %s537_s3, %s293_s8  ;;  %s494_s10 = int_to_ptr.vmem [resolvable:$true] %s227_s10 }
  0x11   : > { %s214_s20 = scalar_lea.sflag (!%p140_p9), [#allocation3], %s159_s6 }
  0x15   : > { %s163_s24 = scalar_select %p162_p10, %s449_s16, 1 }
  0x16   : > { %s407_s16 = smov [#allocation2]  }
  0x17   : > { %s291_s25 = sshll.u32 %s163_s24, 3  ;;  %s342_s24 = scalar_lea.vmem %s494_s10, 128 }
  0x18   : > { %s165_s28 = scalar_lea.vmem %s536_s2, %s291_s25  ;;  %p343_p11 = scmp.ne.s32.totalorder %s494_s10, %s342_s24 }
  0x19   : > { %v166_v0 = vld [vmem:[%s165_s28] sm:$0xff]  ;;  %s346_s25 = sshll.u32 %s407_s16, 4  ;;  %s347_s25 = int_to_ptr.vmem [resolvable:$false] %s346_s25 }
  0x1a   : > { %167 = vadd.xlane.f32.xlu0 %v166_v0  ;;  %p344_p12 = pnand %p343_p11, %p466_p5  ;;  %s348_s26 = scalar_lea.vmem %s347_s25, 256 }
  0x1b   : > { %p349_p0 = scmp.lt.s32.totalorder %s494_s10, %s347_s25  ;;  %p350_p1 = scmp.lt.s32.totalorder %s348_s26, %s342_s24 }
  0x1c   : > { %p345_p13 = pneg %p344_p12 }
  0x1d   : > { %p351_p2 = por %p350_p1, %p349_p0 }
  0x1f   : > { %p352_p3 = pnand %p351_p2, %p345_p13 }
  0xa7   : > { %v168_v1 = vpop.xlane.xlu0 %167 }
  0xa8   : > { %v169_v2 = vrot.slane %v168_v1, 4 }
  0xaa   : > { %v170_v3 = vadd.f32 %v169_v2, %v168_v1 }
  0xac   : > { %v171_v4 = vrot.slane %v170_v3, 2 }
  0xae   : > { %v172_v5 = vadd.f32 %v171_v4, %v170_v3 }
  0xb0   : > { %v173_v6 = vrot.slane %v172_v5, 1 }
  0xb2   : > { %v174_v7 = vadd.f32 %v173_v6, %v172_v5 }
  0xb4   : > { %v175_v8 = vmul.f32 0.0009765625, %v174_v7 }
  0xb6   : > { %v176_v9 = vsub.f32 %v166_v0, %v175_v8 }
  0xb8   : > { %v177_v10 = vmul.f32 %v176_v9, %v176_v9 }
  0xba   : > { %178 = vadd.xlane.f32.xlu0 %v177_v10 }
 0x147   : > { %v179_v12 = vpop.xlane.xlu0 %178 }
 0x148   : > { %v180_v13 = vrot.slane %v179_v12, 4 }
 0x14a   : > { %v181_v14 = vadd.f32 %v180_v13, %v179_v12 }
 0x14c   : > { %v182_v15 = vrot.slane %v181_v14, 2 }
 0x14e   : > { %v183_v16 = vadd.f32 %v182_v15, %v181_v14 }
 0x150   : > { %v184_v17 = vrot.slane %v183_v16, 1 }
 0x152   : > { %v185_v18 = vadd.f32 %v184_v17, %v183_v16 }
 0x154   : > { %v186_v19 = vmul.f32 0.0009775171, %v185_v18 }
 0x156   : > { %338 = vrsqrt.f32 %v186_v19  ;;  %vm189_vm0 = vcmp.eq.f32.partialorder %v186_v19, inf  ;;  %v192_v22 = vand.u32 2147483648, %v186_v19  ;;  %vm191_vm1 = vcmp.eq.f32.partialorder %v186_v19, 0.0 }
 0x160   : > { %v339_v20 = vpop.eup %338 }
 0x161   : > { %v188_v21 = vmul.f32 %v339_v20, %v186_v19 }
 0x163   : > { %v190_v23 = vsel %vm189_vm0, %v186_v19, %v188_v21 }
 0x164   : > { %v193_v24 = vsel %vm191_vm1, %v192_v22, %v190_v23 }
 0x165   : > { %v194_v25 = vadd.f32 1e-05, %v193_v24 }
 0x167   : > { %340 = vrcp.f32 %v194_v25 }
 0x171   : > { %v341_v27 = vpop.eup %340 }
 0x172   : > { %v198_v28 = vmul.f32 %v341_v27, %v197_v26 }
 0x174   : > { %201 = vperm.xlu1 %336, %v198_v28  }
 0x178   : > { %208 = vperm.xlu1 %336, %v205_v29  }
 0x1f3   : > { %v202_v30 = vpop.permute.xlu1 %201 }
 0x1f4   : > { %v204_v31 = vmul.f32 %v202_v30, %v176_v9 }
 0x1f7   : > { %v209_v32 = vpop.permute.xlu1 %208 }
 0x1f8   : > { %v211_v33 = vadd.f32 %v209_v32, %v204_v31 }
 0x1fa   : > { %212 = vst [vmem:[%s161_s9] sm:$0xff] %v211_v33 }
 0x1fb   : > { %355 = shalt.err (!%p352_p3)
}
 0x1fc   : > { %s356_s27 = scalar_lea.hbm %s492_s19, 128  ;;  %s360_s30 = scalar_lea.hbm %s537_s3, 256 }
 0x1fd   : > { %p357_p4 = scmp.ne.s32.totalorder %s492_s19, %s356_s27  ;;  %p361_p9 = scmp.lt.u32.totalorder %s492_s19, %s537_s3 }
 0x1fe   : > { %p362_p10 = scmp.lt.u32.totalorder %s360_s30, %s356_s27  ;;  %p364_p12 = scmp.lt.u32.totalorder %s356_s27, %s492_s19 }
 0x1ff   : > { %p358_p7 = pnand %p357_p4, %p466_p5 }
 0x200   : > { %p363_p11 = por %p362_p10, %p361_p9 }
 0x201   : > { %p359_p8 = pneg %p358_p7 }
 0x202   : > { %p365_p13 = por %p364_p12, %p363_p11 }
 0x204   : > { %p366_p0 = pnand %p365_p13, %p359_p8 }
 0x206   : > { %369 = shalt.err (!%p366_p0)
}
 0x207   : > { %296 = dma.vmem_to_hbm [thread:$0]  (%p466_p5), %s494_s10, 128, %s492_s19, %s214_s20  }
 0x208 PF: > { %p302_p1 = scmp.ge.s32.totalorder %s404_s15, 2  ;;  %s239_s6 = sand.u32 1, %s392_s12  }
 0x209   : > { %s240_s7 = scalar_lea.sflag [#allocation3], %s239_s6 }
 0x20a   : > { %p299_p2 = pnand %p302_p1, %p470_p6 }
 0x20c   : > { %387 = dma.done.wait (!%p299_p2), %s240_s7, 128  }
 0x20d   : > { %389 = vsyncadd (!%p299_p2), %s240_s7, 4294967168  ;;  %p13_p3 = scmp.ge.s32.totalorder %s453_s18, 4   ;;  %s540_s12 = smov %s396_s13 }
 0x20e   : > { %s541_s13 = smov %s400_s14  ;;  %s542_s14 = smov %s464_s21 }
 0x20f   : > { %s543_s15 = smov %s453_s18  ;;  %15 = sbr.rel (!%p13_p3) target bundleno = 3 (0x3), region = 67 }
 0x216   :  { %245 = vsyncpa [#allocation3], 1 }
 0x217   :  { %247 = vsyncpa [#allocation3 + $0x1], 1 }

</bundles_post_ra>
